<compile_context>
chip_gen: v5e
topology: v5e:2x2
jax: 0.10.0
libtpu: 0.0.40
codegen_flags: <defaults>
</compile_context>

<pallas_src>
import jax
import jax.numpy as jnp
from jax.experimental import pallas as pl
from jax.experimental.pallas import tpu as pltpu


def linear_kernel(x_ref, w_ref, b_ref, o_ref):
    """x_ref: (IN_F, B_PAD) f32 VMEM   (features on sublanes, batch on lanes)
       w_ref: (IN_F, 1)     f32 VMEM   (weight column, lane-broadcast)
       b_ref: (1,)          f32 SMEM   (bias scalar)
       o_ref: (1, B_PAD)    f32 VMEM   (lane-dense output)
    """
    x = x_ref[...]                                    # (IN_F, B_PAD)
    w = w_ref[...]                                    # (IN_F, 1)
    # One VPU multiply (lane broadcast of the weight column) followed by an
    # XLU sublane reduce over the feature axis -- no MXU, no serial MAC chain.
    acc = jnp.sum(x * w, axis=0, keepdims=True)       # (1, B_PAD) f32
    o_ref[...] = (acc + b_ref[0]).astype(o_ref.dtype)


@jax.jit
def simple_net_forward(x, weight, bias):
    """Equivalent of nn.Linear(in_f, 1): returns x @ weight.T + bias, shape (B, 1).

    x:      (B, in_f)
    weight: (out_f=1, in_f)
    bias:   (out_f=1,)
    """
    B, in_f = x.shape
    out_f = weight.shape[0]
    assert out_f == 1, "kernel is specialized to nn.Linear(in_f, 1)"

    # Batch on the lane axis, padded up to a full 128-lane vreg width.
    # Under jit these layout ops fuse with the surrounding graph.
    b_pad = ((B + 127) // 128) * 128
    x_t = jnp.pad(x.T, ((0, 0), (0, b_pad - B)))      # (in_f, b_pad)
    w_col = weight.reshape(in_f, 1)                   # (in_f, 1)

    cost = pl.CostEstimate(
        flops=2 * B * in_f,
        transcendentals=0,
        bytes_accessed=4 * (in_f * b_pad + in_f + 1 + b_pad),
    )

    out_t = pl.pallas_call(
        linear_kernel,
        out_shape=jax.ShapeDtypeStruct((1, b_pad), x.dtype),
        in_specs=[
            pl.BlockSpec(memory_space=pltpu.MemorySpace.VMEM),   # x_t (whole array)
            pl.BlockSpec(memory_space=pltpu.MemorySpace.VMEM),   # weight column
            pl.BlockSpec(memory_space=pltpu.MemorySpace.SMEM),   # bias scalar (1D)
        ],
        out_specs=pl.BlockSpec(memory_space=pltpu.MemorySpace.VMEM),
        cost_estimate=cost,
    )(x_t, w_col, bias)

    # Padded lanes only ever hold 0*w + bias and are sliced off here.
    return out_t[:, :B].T                             # (B, 1)


if __name__ == "__main__":
    key = jax.random.PRNGKey(0)
    kx, kw, kb = jax.random.split(key, 3)

    B, IN_F, OUT_F = 100, 10, 1

    # Deterministic example input (matches torch.randn(100, 10) semantics).
    x = jax.random.normal(kx, (B, IN_F), dtype=jnp.float32)

    # Parameter init mimicking nn.Linear(10, 1): U(-1/sqrt(fan_in), 1/sqrt(fan_in)).
    bound = 1.0 / (IN_F ** 0.5)
    weight = jax.random.uniform(kw, (OUT_F, IN_F), jnp.float32, -bound, bound)
    bias = jax.random.uniform(kb, (OUT_F,), jnp.float32, -bound, bound)

    out = jax.block_until_ready(simple_net_forward(x, weight, bias))

    # Sanity check against plain-JAX reference.
    ref = x @ weight.T + bias
    assert out.shape == (B, OUT_F), out.shape
    assert jnp.allclose(out, ref, atol=1e-5, rtol=1e-5)

    print("KERNEL_OK")
</pallas_src>

<mosaic_0001>
module attributes {stable_mosaic.version = 11 : i64} {
  func.func @linear_kernel(%arg0: memref<10x128xf32, #tpu.memory_space<vmem>>, %arg1: memref<10x1xf32, #tpu.memory_space<vmem>>, %arg2: memref<1xf32, #tpu.memory_space<smem>>, %arg3: memref<1x128xf32, #tpu.memory_space<vmem>>) attributes {dimension_semantics = [], scalar_prefetch = 0 : i64, scratch_operands = 0 : i64, tpu.core_type = #tpu.core_type<tc>} {
    %c0 = arith.constant 0 : index
    %c0_0 = arith.constant 0 : index
    %0 = vector.load %arg0[%c0, %c0_0] : memref<10x128xf32, #tpu.memory_space<vmem>>, vector<10x128xf32>
    %c0_1 = arith.constant 0 : index
    %c0_2 = arith.constant 0 : index
    %1 = vector.load %arg1[%c0_1, %c0_2] : memref<10x1xf32, #tpu.memory_space<vmem>>, vector<10x1xf32>
    %2 = vector.broadcast %1 : vector<10x1xf32> to vector<10x128xf32>
    %3 = arith.mulf %0, %2 : vector<10x128xf32>
    %cst = arith.constant dense<0.000000e+00> : vector<128xf32>
    %4 = vector.multi_reduction <add>, %3, %cst [0] : vector<10x128xf32> to vector<128xf32>
    %5 = vector.shape_cast %4 : vector<128xf32> to vector<1x128xf32>
    %c0_3 = arith.constant 0 : index
    %6 = memref.load %arg2[%c0_3] : memref<1xf32, #tpu.memory_space<smem>>
    %7 = vector.broadcast %6 : f32 to vector<1x128xf32>
    %8 = arith.addf %5, %7 : vector<1x128xf32>
    %c0_4 = arith.constant 0 : index
    %c0_5 = arith.constant 0 : index
    %9 = vector.load %arg3[%c0_4, %c0_5] : memref<1x128xf32, #tpu.memory_space<vmem>>, vector<1x128xf32>
    tpu.vector_store %arg3[%c0_4, %c0_5], %8 {strides = array<i32>} : memref<1x128xf32, #tpu.memory_space<vmem>>, vector<1x128xf32>,
    return
  }
}

</mosaic_0001>

<bundles_post_ra>
// kernel: simple_net_forward.1
= control target key start
LH: loop header
LB: loop body
LE: loop exit
PB: predicated region body
PF: predicated region fallthrough
CT: control target
= control target key end

     0   :  { %v50_v0 = vmov 0   ;;  %vm31_vm0 = vcmask 1041408   ;;  %s89_s1 = inlined_call_operand.vmem [shape: f32[10,1], index: 1, kind: input, shape index: {}]   ;;  %s90_s0 = inlined_call_operand.vmem [shape: f32[10,128], index: 0, kind: input, shape index: {}]   ;;  %s91_s2 = inlined_call_operand.<no memory space> [shape: f32[1], index: 2, kind: input, shape index: {}]   ;;  %s92_s3 = inlined_call_operand.vmem [shape: f32[1,128], index: 3, kind: output, shape index: {}]  }
   0x1   :  { %49 = vset.pattern.permute.xlu0 %v50_v0  ;;  %v18_v1 = vld [vmem:[%s89_s1 + $0x8] sm:$0x3]  ;;  %v17_v2 = vld [vmem:[%s89_s1] sm:$0xff]  ;;  %v41_v16 = vstv %s91_s2 }
   0x2   :  { %26 = vperm.xlu0 %49, %v18_v1   ;;  %v16_v4 = vld [vmem:[%s90_s0 + $0x8] sm:$0x3]  ;;  %v15_v6 = vld [vmem:[%s90_s0] sm:$0xff] }
   0xa   :  { %21 = vperm.xlu0 %49, %v17_v2  }
  0x74   :  { %v27_v3 = vpop.permute.xlu0 %26 }
  0x75   :  { %v30_v5 = vmul.f32 %v27_v3, %v16_v4 }
  0x77   :  { %v32_v9 = vsel %vm31_vm0, %v30_v5, 0.0 }
  0x7c   :  { %v22_v7 = vpop.permute.xlu0 %21 }
  0x7d   :  { %v29_v8 = vmul.f32 %v22_v7, %v15_v6 }
  0x7f   :  { %v33_v10 = vadd.f32 %v32_v9, %v29_v8 }
  0x81   :  { %v34_v11 = vrot.slane %v33_v10, 4 }
  0x83   :  { %v35_v12 = vadd.f32 %v34_v11, %v33_v10 }
  0x85   :  { %v36_v13 = vrot.slane %v35_v12, 2 }
  0x87   :  { %v37_v14 = vadd.f32 %v36_v13, %v35_v12 }
  0x89   :  { %v38_v15 = vrot.slane %v37_v14, 1 }
  0x8b   :  { %v39_v17 = vadd.f32 %v38_v15, %v37_v14 }
  0x8d   :  { %v42_v18 = vadd.f32 %v41_v16, %v39_v17 }
  0x8f   :  { %43 = vst [vmem:[%s92_s3] sm:$0x1] %v42_v18 }

</bundles_post_ra>
